<compile_context>
chip_gen: v5e
topology: v5e:2x2
jax: 0.10.0
libtpu: 0.0.40
codegen_flags: <defaults>
</compile_context>

<pallas_src>
import jax
import jax.numpy as jnp
from jax.experimental import pallas as pl
from jax.experimental.pallas import tpu as pltpu


def _value_head_kernel(x_ref, w_ref, b_ref, o_ref):
    # x_ref: (tm, D) VMEM   w_ref: (1, D) VMEM   b_ref: (1,) SMEM   o_ref: (1, tm)
    x = x_ref[...].astype(jnp.float32)      # f32 compute (v5e VPU has no bf16)
    w = w_ref[...].astype(jnp.float32)      # (1, D) broadcasts over rows
    row = jnp.sum(x * w, axis=-1)           # (tm,)  VPU multiply + lane reduce
    o_ref[...] = (row + b_ref[0]).reshape(1, -1).astype(o_ref.dtype)


def _round_up(a: int, b: int) -> int:
    return (a + b - 1) // b * b


def _pick_tm(n: int, d: int, itemsize: int) -> int:
    """Pick the batch-tile row count: as large as the VMEM byte budget allows."""
    budget = 16 * 1024 * 1024               # bytes for the double-buffered x tiles
    tm = budget // max(1, 2 * d * itemsize)
    tm = max(8, min(tm, 2048))
    n8 = _round_up(max(n, 1), 8)
    if tm >= n8:
        return n8                           # one block covers the whole batch
    return max(128, (tm // 128) * 128)      # keep the output slabs lane-dense


@jax.jit
def fully_connected_value_head(x, weight, bias):
    """Equivalent of nn.Linear(dim_input, 1)(x).

    x:      (..., dim_input)
    weight: (1, dim_input)  -- PyTorch layout
    bias:   (1,)
    returns (..., 1)
    """
    orig_shape = x.shape
    d = orig_shape[-1]
    x2 = x.reshape(-1, d)
    n = x2.shape[0]

    tm = _pick_tm(n, d, x2.dtype.itemsize)
    n_blocks = pl.cdiv(n, tm)
    n_pad = n_blocks * tm

    w = weight.reshape(1, d)                    # lane-dense weight row (resident)
    b = bias.reshape(1).astype(jnp.float32)     # SMEM scalar

    out = pl.pallas_call(
        _value_head_kernel,
        out_shape=jax.ShapeDtypeStruct((1, n_pad), x.dtype),
        grid=(n_blocks,),
        in_specs=[
            pl.BlockSpec((tm, d), lambda i: (i, 0)),              # x batch tile
            pl.BlockSpec((1, d), lambda i: (0, 0)),               # weight, stays in VMEM
            pl.BlockSpec(memory_space=pltpu.MemorySpace.SMEM),    # bias scalar
        ],
        out_specs=pl.BlockSpec((1, tm), lambda i: (0, i)),        # lane-dense output slab
        compiler_params=pltpu.CompilerParams(
            dimension_semantics=("parallel",),                    # shard across TCs on v7x
            vmem_limit_bytes=48 * 1024 * 1024,
        ),
    )(x2, w, b)

    out = out.reshape(n_pad)[:n]
    return out.reshape(*orig_shape[:-1], 1)


if __name__ == "__main__":
    key = jax.random.PRNGKey(0)
    k_x, k_w, k_b, k_x2 = jax.random.split(key, 4)

    batch, dim_input = 2, 32
    x = jax.random.normal(k_x, (batch, dim_input), dtype=jnp.float32)

    # Deterministic params matching nn.Linear(dim_input, 1) init ranges.
    bound = 1.0 / (dim_input ** 0.5)
    weight = jax.random.uniform(k_w, (1, dim_input), jnp.float32, -bound, bound)
    bias = jax.random.uniform(k_b, (1,), jnp.float32, -bound, bound)

    y = fully_connected_value_head(x, weight, bias)
    jax.block_until_ready(y)
    y_ref = x @ weight.T + bias
    assert y.shape == (batch, 1)
    assert jnp.allclose(y, y_ref, atol=1e-5, rtol=1e-5)

    # Extra check: leading batch dims + ragged row count (15 rows, not /8).
    x3 = jax.random.normal(k_x2, (3, 5, dim_input), dtype=jnp.float32)
    y3 = fully_connected_value_head(x3, weight, bias)
    jax.block_until_ready(y3)
    y3_ref = x3 @ weight.T + bias
    assert y3.shape == (3, 5, 1)
    assert jnp.allclose(y3, y3_ref, atol=1e-5, rtol=1e-5)

    print("KERNEL_OK")
</pallas_src>

<mosaic_0001>
module attributes {stable_mosaic.version = 11 : i64} {
  func.func @_value_head_kernel(%arg0: i32, %arg1: memref<8x32xf32, #tpu.memory_space<vmem>>, %arg2: memref<1x32xf32, #tpu.memory_space<vmem>>, %arg3: memref<1xf32, #tpu.memory_space<smem>>, %arg4: memref<1x8xf32, #tpu.memory_space<vmem>>) attributes {dimension_semantics = [#tpu.dimension_semantics<parallel>], iteration_bounds = array<i64: 1>, scalar_prefetch = 0 : i64, scratch_operands = 0 : i64, tpu.core_type = #tpu.core_type<tc>, window_params = [{transform_indices = @transform_0, window_bounds = array<i64: 8, 32>}, {pipeline_mode = #tpu.pipeline_mode<synchronous>, transform_indices = @transform_1, window_bounds = array<i64: 1, 32>}, {transform_indices = @transform_2, window_bounds = array<i64: 1>}, {transform_indices = @transform_3, window_bounds = array<i64: 1, 8>}]} {
    %c0 = arith.constant 0 : index
    %c0_0 = arith.constant 0 : index
    %0 = vector.load %arg1[%c0, %c0_0] : memref<8x32xf32, #tpu.memory_space<vmem>>, vector<8x32xf32>
    %c0_1 = arith.constant 0 : index
    %c0_2 = arith.constant 0 : index
    %1 = vector.load %arg2[%c0_1, %c0_2] : memref<1x32xf32, #tpu.memory_space<vmem>>, vector<1x32xf32>
    %2 = vector.broadcast %1 : vector<1x32xf32> to vector<8x32xf32>
    %3 = arith.mulf %0, %2 : vector<8x32xf32>
    %cst = arith.constant dense<0.000000e+00> : vector<8xf32>
    %4 = vector.multi_reduction <add>, %3, %cst [1] : vector<8x32xf32> to vector<8xf32>
    %c0_3 = arith.constant 0 : index
    %5 = memref.load %arg3[%c0_3] : memref<1xf32, #tpu.memory_space<smem>>
    %6 = vector.broadcast %5 : f32 to vector<8xf32>
    %7 = arith.addf %4, %6 : vector<8xf32>
    %8 = vector.shape_cast %7 : vector<8xf32> to vector<1x8xf32>
    %c0_4 = arith.constant 0 : index
    %c0_5 = arith.constant 0 : index
    %9 = vector.load %arg4[%c0_4, %c0_5] : memref<1x8xf32, #tpu.memory_space<vmem>>, vector<1x8xf32>
    tpu.vector_store %arg4[%c0_4, %c0_5], %8 {strides = array<i32>} : memref<1x8xf32, #tpu.memory_space<vmem>>, vector<1x8xf32>,
    return
  }
  func.func @transform_0(%arg0: i32) -> (i32, i32) {
    %c0_i32 = arith.constant 0 : i32
    %c0_i32_0 = arith.constant 0 : i32
    return %arg0, %c0_i32 : i32, i32
  }
  func.func @transform_1(%arg0: i32) -> (i32, i32) {
    %c0_i32 = arith.constant 0 : i32
    %c0_i32_0 = arith.constant 0 : i32
    %c0_i32_1 = arith.constant 0 : i32
    return %c0_i32, %c0_i32_0 : i32, i32
  }
  func.func @transform_2(%arg0: i32) -> i32 {
    %c0_i32 = arith.constant 0 : i32
    %c0_i32_0 = arith.constant 0 : i32
    return %c0_i32 : i32
  }
  func.func @transform_3(%arg0: i32) -> (i32, i32) {
    %c0_i32 = arith.constant 0 : i32
    %c0_i32_0 = arith.constant 0 : i32
    return %c0_i32, %arg0 : i32, i32
  }
}

</mosaic_0001>

<bundles_post_ra>
// kernel: fully_connected_value_head.1
= control target key start
LH: loop header
LB: loop body
LE: loop exit
PB: predicated region body
PF: predicated region fallthrough
CT: control target
= control target key end

     0   :  { %9 = vsyncpa [#allocation4], 0  ;;  %s82_s15 = smov [#allocation3]   ;;  %s115_s0 = inlined_call_operand.vmem [shape: f32[2,32], index: 0, kind: input, shape index: {}]   ;;  %s116_s1 = inlined_call_operand.hbm [shape: f32[1,32], index: 1, kind: input, shape index: {}]   ;;  %s117_s2 = inlined_call_operand.<no memory space> [shape: f32[1], index: 2, kind: input, shape index: {}]   ;;  %s118_s3 = inlined_call_operand.vmem [shape: f32[1,8], index: 3, kind: output, shape index: {}]  }
   0x1   :  { %s17_s14 = sshll.u32 %s116_s1, 4  ;;  %s19_s16 = sshll.u32 %s82_s15, 4  ;;  %s18_s14 = int_to_ptr.hbm [resolvable:$true] %s17_s14  ;;  %s20_s16 = int_to_ptr.vmem [resolvable:$true] %s19_s16 }
   0x2   :  { %22 = dma.hbm_to_vmem [thread:$0]  %s18_s14, 16, %s20_s16, [#allocation4]  }
   0x3   :  { %80 = dma.done.wait [#allocation4], 16  }
   0x4   :  { %81 = vsyncadd [#allocation4], 4294967280  ;;  %v29_v0 = vld [vmem:[%s115_s0] sm:$0xff]  ;;  %vm35_vm0 = vcmask 261120   ;;  %v43_v4 = vlaneseq  ;;  %v40_v5 = vstv %s117_s2  ;;  %vm47_vm1 = vcmask 57344  }
   0x5   :  { %v55_v1 = vld [vmem:[#allocation3] ss:$0 sm:$0xff] }
   0x6   :  { %v34_v2 = vmul.f32 %v55_v1, %v29_v0  ;;  %v44_v6 = vand.u32 127, %v43_v4 }
   0x8   :  { %v36_v3 = vsel %vm35_vm0, %v34_v2, 0.0 }
   0x9   :  { %37 = vadd.xlane.f32.xlu0 %v36_v3 }
  0x7c   :  { %v38_v7 = vpop.xlane.xlu0 %37 }
  0x7d   :  { %v41_v8 = vadd.f32 %v40_v5, %v38_v7 }
  0x7f   :  { %v45_v9 = vperm.slane %v41_v8, %v44_v6 }
  0x81   :  { %48 = vst.msk [vmem:[%s118_s3] sm:$0x1] %vm47_vm1, %v45_v9 }
  0x82   :  { %53 = vsyncpa [#allocation4], 1 }

</bundles_post_ra>
